<compile_context>
chip_gen: v5e
topology: v5e:2x2
jax: 0.10.0
libtpu: 0.0.40
codegen_flags: <defaults>
</compile_context>

<pallas_src>
import numpy as np
import jax
import jax.numpy as jnp
from jax.experimental import pallas as pl
from jax.experimental.pallas import tpu as pltpu


_SUBLANE_PACK = 16              # block row granularity (bf16-friendly)
_PALLAS_MIN_ELEMS = 1 << 20     # below this, plain XLA fusion wins


def _cdiv(a, b):
    return -(-a // b)


def _round_up(x, m):
    return _cdiv(x, m) * m


def _choose_cols(n):
    """Widest lane-dense last dim that divides n exactly (None -> fallback)."""
    for c in (1024, 512, 256, 128):
        if n % c == 0 and n >= c:
            return c
    return None


def _chip_budget():
    """(per-operand tile bytes, scoped vmem limit) tuned per TPU generation."""
    vmem_cap = 64 * 1024 * 1024           # conservative default (v7x)
    try:
        vmem_cap = int(pltpu.get_tpu_info().vmem_capacity_bytes)
    except Exception:
        pass
    if vmem_cap >= 100 * 1024 * 1024:     # v5e / v6e: 128 MiB physical VMEM
        return 8 * 1024 * 1024, 64 * 1024 * 1024
    return 4 * 1024 * 1024, 32 * 1024 * 1024   # v7x: 64 MiB physical VMEM


def _make_arf_kernel(lg_in_vmem: bool, lr_in_vmem: bool):
    """Kernel specialized on which loss operands live in VMEM vs SMEM.

    Args: (scalars_smem, [lg_vmem], [lr_vmem], out_vmem)
    scalars_smem (4,) f32 = [0.5/w^2, log(w), lg_scalar_or_0, lr_scalar_or_0]
    """

    def kernel(s_ref, *refs):
        inv_sq = s_ref[0]
        log_w = s_ref[1]
        idx = 0
        if lg_in_vmem:
            lg = refs[idx][...].astype(jnp.float32)
            idx += 1
        else:
            lg = s_ref[2]
        if lr_in_vmem:
            lr = refs[idx][...].astype(jnp.float32)
            idx += 1
        else:
            lr = s_ref[3]
        out_ref = refs[idx]
        out_ref[...] = inv_sq * lg + lr + log_w
        # TODO(synk): the PyTorch module's host-side debug print() is not
        # replicated inside the kernel.

    return kernel


def arf_loss_forward(global_weight, l_global, l_relax, *, force_pallas=False):
    """Pallas implementation of ArfLossModel.forward (forward pass only)."""
    gw = jnp.asarray(global_weight, jnp.float32).reshape(1)
    l_global = jnp.asarray(l_global)
    l_relax = jnp.asarray(l_relax)

    out_shape = jnp.broadcast_shapes((1,), l_global.shape, l_relax.shape)
    n = int(np.prod(out_shape)) if len(out_shape) > 0 else 1

    lg_is_scalar = l_global.size == 1
    lr_is_scalar = l_relax.size == 1
    lg_in_vmem = not lg_is_scalar
    lr_in_vmem = not lr_is_scalar

    def fused():
        # XLA-fused reference expression; already at HBM roofline for a FMA+add.
        return 0.5 / jnp.square(gw) * l_global + l_relax + jnp.log(gw)

    # Partial broadcasts (non-scalar operand whose shape != broadcast shape)
    # would require materializing the broadcast in HBM -- use the fused path.
    partial_bcast = (
        (lg_in_vmem and tuple(l_global.shape) != tuple(out_shape))
        or (lr_in_vmem and tuple(l_relax.shape) != tuple(out_shape))
    )

    cols = _choose_cols(n)

    if (
        (lg_is_scalar and lr_is_scalar)
        or partial_bcast
        or cols is None
        or (not force_pallas and n < _PALLAS_MIN_ELEMS)
    ):
        return fused()

    # ---------------- Pallas path: exact (rows, cols) slab, 1-D grid --------
    rows = n // cols
    per_op_tile_bytes, vmem_limit = _chip_budget()

    budget_rows = max(
        _SUBLANE_PACK,
        (per_op_tile_bytes // (cols * 4)) // _SUBLANE_PACK * _SUBLANE_PACK,
    )
    if rows > budget_rows:
        tile_rows = budget_rows                      # multiple of 16
    else:
        tile_rows = rows                             # full dim: always legal
        if rows >= 2 * _SUBLANE_PACK:
            # Split single-tile grids into >=2 parallel steps (v7x: 2 TCs).
            half = _round_up(_cdiv(rows, 2), _SUBLANE_PACK)
            if half < rows:
                tile_rows = half
    num_tiles = _cdiv(rows, tile_rows)               # boundary block is masked

    # Hoisted scalars -> SMEM (no materialized broadcasts).
    w_s = gw[0]
    inv_sq = 0.5 / (w_s * w_s)
    log_w = jnp.log(w_s)
    lg_s = (l_global.reshape(()).astype(jnp.float32)
            if lg_is_scalar else jnp.zeros((), jnp.float32))
    lr_s = (l_relax.reshape(()).astype(jnp.float32)
            if lr_is_scalar else jnp.zeros((), jnp.float32))
    scalars = jnp.stack([inv_sq, log_w, lg_s, lr_s])

    tile_spec = pl.BlockSpec((tile_rows, cols), lambda i: (i, 0))
    in_specs = [pl.BlockSpec(memory_space=pltpu.MemorySpace.SMEM)]
    vmem_ops = []
    if lg_in_vmem:
        vmem_ops.append(l_global.reshape(rows, cols))   # native dtype, no copy
        in_specs.append(tile_spec)
    if lr_in_vmem:
        vmem_ops.append(l_relax.reshape(rows, cols))
        in_specs.append(tile_spec)

    out_slab = pl.pallas_call(
        _make_arf_kernel(lg_in_vmem, lr_in_vmem),
        grid=(num_tiles,),
        in_specs=in_specs,
        out_specs=pl.BlockSpec((tile_rows, cols), lambda i: (i, 0)),
        out_shape=jax.ShapeDtypeStruct((rows, cols), jnp.float32),
        compiler_params=pltpu.CompilerParams(
            dimension_semantics=("parallel",),
            vmem_limit_bytes=vmem_limit,
        ),
    )(scalars, *vmem_ops)

    # Exact slab (rows*cols == n): plain reshape, no slice, no extra HBM copy.
    return out_slab.reshape(out_shape)


class ArfLossModelPallas:
    """Mirror of the PyTorch module with deterministic parameter init."""

    def __init__(self):
        # torch.nn.Parameter(torch.ones(1)) for both weights.
        self.global_weight = jnp.ones((1,), jnp.float32)
        self.local_weight = jnp.ones((1,), jnp.float32)   # unused in forward

    def __call__(self, l_global, l_relax, *, force_pallas=False):
        return arf_loss_forward(
            self.global_weight, l_global, l_relax, force_pallas=force_pallas
        )


if __name__ == "__main__":
    key = jax.random.PRNGKey(0)
    k1, k2, k3, k4, k5, k6 = jax.random.split(key, 6)

    model = ArfLossModelPallas()

    def ref_fn(gw, lg, lr):
        gw = jnp.asarray(gw, jnp.float32).reshape(1)
        lg = jnp.asarray(lg, jnp.float32)
        lr = jnp.asarray(lr, jnp.float32)
        return 0.5 / jnp.square(gw) * lg + lr + jnp.log(gw)

    # Case 1: real ArfLoss use case (8 scalar losses) -> fused-jnp fast path.
    lg_small = jax.random.uniform(k1, (8,), jnp.float32, minval=0.1, maxval=2.0)
    lr_small = jax.random.uniform(k2, (8,), jnp.float32, minval=0.1, maxval=2.0)
    out_small = jax.block_until_ready(model(lg_small, lr_small))
    np.testing.assert_allclose(
        np.asarray(out_small), np.asarray(ref_fn(model.global_weight, lg_small, lr_small)),
        rtol=1e-6, atol=1e-6)

    # Case 2: f32 loss maps, forced Pallas path (single-tile lane-dense slab).
    lg_map = jax.random.uniform(k3, (2, 4, 16, 16), jnp.float32, minval=0.1, maxval=2.0)
    lr_map = jax.random.uniform(k4, (2, 4, 16, 16), jnp.float32, minval=0.1, maxval=2.0)
    out_map = jax.block_until_ready(model(lg_map, lr_map, force_pallas=True))
    np.testing.assert_allclose(
        np.asarray(out_map), np.asarray(ref_fn(model.global_weight, lg_map, lr_map)),
        rtol=1e-6, atol=1e-6)

    # Case 3: bf16 loss map streamed in bf16 + size-1 l_relax broadcast from SMEM.
    lg_bf16 = lg_map.astype(jnp.bfloat16)
    lr_scalar = jnp.full((1,), 0.25, jnp.float32)
    out_bcast = jax.block_until_ready(model(lg_bf16, lr_scalar, force_pallas=True))
    np.testing.assert_allclose(
        np.asarray(out_bcast),
        np.asarray(ref_fn(model.global_weight, lg_bf16, lr_scalar)),
        rtol=2e-2, atol=2e-2)

    # Case 4: larger map -> multi-step parallel grid (2 tiles), weight != 1.
    gw2 = jnp.full((1,), 0.8, jnp.float32)
    lg_big = jax.random.uniform(k5, (8, 4, 32, 32), jnp.float32, minval=0.1, maxval=2.0)
    lr_big = jax.random.uniform(k6, (8, 4, 32, 32), jnp.float32, minval=0.1, maxval=2.0)
    out_big = jax.block_until_ready(
        arf_loss_forward(gw2, lg_big, lr_big, force_pallas=True))
    np.testing.assert_allclose(
        np.asarray(out_big), np.asarray(ref_fn(gw2, lg_big, lr_big)),
        rtol=1e-6, atol=1e-6)

    print("KERNEL_OK")
</pallas_src>

<mosaic_0001>
module attributes {stable_mosaic.version = 11 : i64} {
  func.func @kernel(%arg0: i32, %arg1: memref<4xf32, #tpu.memory_space<smem>>, %arg2: memref<2x1024xf32, #tpu.memory_space<vmem>>, %arg3: memref<2x1024xf32, #tpu.memory_space<vmem>>, %arg4: memref<2x1024xf32, #tpu.memory_space<vmem>>) attributes {dimension_semantics = [#tpu.dimension_semantics<parallel>], iteration_bounds = array<i64: 1>, scalar_prefetch = 0 : i64, scratch_operands = 0 : i64, tpu.core_type = #tpu.core_type<tc>, window_params = [{transform_indices = @transform_0, window_bounds = array<i64: 4>}, {transform_indices = @transform_1, window_bounds = array<i64: 2, 1024>}, {transform_indices = @transform_2, window_bounds = array<i64: 2, 1024>}, {transform_indices = @transform_3, window_bounds = array<i64: 2, 1024>}]} {
    %c0 = arith.constant 0 : index
    %0 = memref.load %arg1[%c0] : memref<4xf32, #tpu.memory_space<smem>>
    %c1 = arith.constant 1 : index
    %1 = memref.load %arg1[%c1] : memref<4xf32, #tpu.memory_space<smem>>
    %c0_0 = arith.constant 0 : index
    %c0_1 = arith.constant 0 : index
    %2 = vector.load %arg2[%c0_0, %c0_1] : memref<2x1024xf32, #tpu.memory_space<vmem>>, vector<2x1024xf32>
    %c0_2 = arith.constant 0 : index
    %c0_3 = arith.constant 0 : index
    %3 = vector.load %arg3[%c0_2, %c0_3] : memref<2x1024xf32, #tpu.memory_space<vmem>>, vector<2x1024xf32>
    %4 = vector.broadcast %0 : f32 to vector<2x1024xf32>
    %5 = arith.mulf %4, %2 : vector<2x1024xf32>
    %6 = arith.addf %5, %3 : vector<2x1024xf32>
    %7 = vector.broadcast %1 : f32 to vector<2x1024xf32>
    %8 = arith.addf %6, %7 : vector<2x1024xf32>
    %c0_4 = arith.constant 0 : index
    %c0_5 = arith.constant 0 : index
    %9 = vector.load %arg4[%c0_4, %c0_5] : memref<2x1024xf32, #tpu.memory_space<vmem>>, vector<2x1024xf32>
    tpu.vector_store %arg4[%c0_4, %c0_5], %8 {strides = array<i32>} : memref<2x1024xf32, #tpu.memory_space<vmem>>, vector<2x1024xf32>,
    return
  }
  func.func @transform_0(%arg0: i32) -> i32 {
    %c0_i32 = arith.constant 0 : i32
    %c0_i32_0 = arith.constant 0 : i32
    return %c0_i32 : i32
  }
  func.func @transform_1(%arg0: i32) -> (i32, i32) {
    %c0_i32 = arith.constant 0 : i32
    %c0_i32_0 = arith.constant 0 : i32
    return %arg0, %c0_i32 : i32, i32
  }
  func.func @transform_2(%arg0: i32) -> (i32, i32) {
    %c0_i32 = arith.constant 0 : i32
    %c0_i32_0 = arith.constant 0 : i32
    return %arg0, %c0_i32 : i32, i32
  }
  func.func @transform_3(%arg0: i32) -> (i32, i32) {
    %c0_i32 = arith.constant 0 : i32
    %c0_i32_0 = arith.constant 0 : i32
    return %arg0, %c0_i32 : i32, i32
  }
}

</mosaic_0001>

<bundles_post_ra>
// kernel: tpu_custom_call.1
= control target key start
LH: loop header
LB: loop body
LE: loop exit
PB: predicated region body
PF: predicated region fallthrough
CT: control target
= control target key end

     0   :  { %8 = vsyncpa [#allocation5], 0  ;;  %s224_s0 = inlined_call_operand.hbm [shape: f32[4], index: 0, kind: input, shape index: {}]   ;;  %s225_s1 = inlined_call_operand.hbm [shape: f32[2,1024], index: 1, kind: input, shape index: {}]   ;;  %s226_s2 = inlined_call_operand.hbm [shape: f32[2,1024], index: 2, kind: input, shape index: {}]   ;;  %s227_s3 = inlined_call_operand.hbm [shape: f32[2,1024], index: 3, kind: output, shape index: {}]  }
   0x1   :  { %9 = vsyncpa [#allocation3], 0 }
   0x2   :  { %10 = vsyncpa [#allocation8], 0 }
   0x3   :  { %11 = vsyncpa [#allocation4], 0  ;;  %s17_s14 = sshll.u32 %s224_s0, 4  ;;  %s26_s17 = sshll.u32 %s225_s1, 4  ;;  %s18_s14 = int_to_ptr.hbm [resolvable:$true] %s17_s14  ;;  %s27_s17 = int_to_ptr.hbm [resolvable:$true] %s26_s17 }
   0x4   :  { %s188_s18 = smov [#allocation2]   ;;  %s189_s19 = smov [#allocation6]  }
   0x5   :  { %20 = dma.hbm_to_smem %s18_s14, 16, %s188_s18, [#allocation5]  }
   0x6   :  { %s28_s20 = sshll.u32 %s189_s19, 4  ;;  %s37_s23 = sshll.u32 %s226_s2, 4  ;;  %s29_s20 = int_to_ptr.vmem [resolvable:$true] %s28_s20  ;;  %s38_s23 = int_to_ptr.hbm [resolvable:$true] %s37_s23 }
   0x7   :  { %31 = dma.hbm_to_vmem [thread:$0]  %s27_s17, 256, %s29_s20, [#allocation3]  }
   0x8   :  { %s190_s24 = smov [#allocation7]  }
   0x9   :  { %s39_s25 = sshll.u32 %s190_s24, 4  ;;  %s40_s25 = int_to_ptr.vmem [resolvable:$true] %s39_s25 }
   0xa   :  { %42 = dma.hbm_to_vmem [thread:$0]  %s38_s23, 256, %s40_s25, [#allocation8]  }
   0xb   :  { %180 = dma.done.wait [#allocation5], 16  }
   0xc   :  { %181 = vsyncadd [#allocation5], 4294967280 }
   0xd   :  { %182 = dma.done.wait [#allocation3], 256  }
   0xe   :  { %183 = vsyncadd [#allocation3], 4294967040 }
   0xf   :  { %184 = dma.done.wait [#allocation8], 256  }
  0x10   :  { %185 = vsyncadd [#allocation8], 4294967040 }
  0x11   :  { %55 = sfence }
  0x12   :  { %s56_s0 = sld [smem:[#allocation2]]  ;;  %v58_v0 = vld [vmem:[#allocation6] sm:$0xff]  ;;  %v59_v1 = vld [vmem:[#allocation6 + $0x8] sm:$0xff]  ;;  %v60_v2 = vld [vmem:[#allocation7] sm:$0xff]  ;;  %s191_s2 = smov [#allocation9]  }
  0x13   :  { %s91_s1 = sld [smem:[#allocation2 + $0x1]]  ;;  %v61_v4 = vld [vmem:[#allocation7 + $0x8] sm:$0xff]  ;;  %s77_s26 = sshll.u32 %s191_s2, 4  ;;  %s78_s26 = int_to_ptr.vmem [resolvable:$true] %s77_s26 }
  0x14   :  { %s79_s29 = sshll.u32 %s227_s3, 4  ;;  %s80_s29 = int_to_ptr.hbm [resolvable:$true] %s79_s29 }
  0x18   :  { %v62_v3 = vstv %s56_s0 }
  0x19   :  { %v63_v5 = vmul.f32 %v62_v3, %v58_v0  ;;  %v64_v6 = vmul.f32 %v62_v3, %v59_v1  ;;  %v67_v7 = vstv %s91_s1 }
  0x1b   :  { %v65_v8 = vadd.f32 %v63_v5, %v60_v2  ;;  %v66_v9 = vadd.f32 %v64_v6, %v61_v4 }
  0x1d   :  { %v68_v10 = vadd.f32 %v67_v7, %v65_v8  ;;  %v69_v11 = vadd.f32 %v67_v7, %v66_v9 }
  0x1f   :  { %70 = vst [vmem:[#allocation9] sm:$0xff] %v68_v10 }
  0x20   :  { %71 = vst [vmem:[#allocation9 + $0x8] sm:$0xff] %v69_v11 }
  0x21   :  { %82 = dma.vmem_to_hbm [thread:$0]  %s78_s26, 256, %s80_s29, [#allocation4]  }
  0x22   :  { %186 = dma.done.wait [#allocation4], 256  }
  0x23   :  { %187 = vsyncadd [#allocation4], 4294967040 }
  0x24   :  { %87 = vsyncpa [#allocation3], 1 }
  0x25   :  { %88 = vsyncpa [#allocation8], 1 }
  0x26   :  { %89 = vsyncpa [#allocation4], 1 }
  0x27   :  { %90 = vsyncpa [#allocation5], 1 }

</bundles_post_ra>
